<compile_context>
chip_gen: v6e
topology: v6e:2x2x1
jax: 0.10.0
libtpu: 0.0.40
codegen_flags: <defaults>
</compile_context>

<pallas_src>
from functools import partial

import jax
import jax.numpy as jnp
from jax.experimental import pallas as pl
from jax.experimental.pallas import tpu as pltpu


def make_kernel(n_layers, input_size, hidden_size, output_size):
    H = hidden_size
    O = output_size

    def kernel(xe_ref, hc_ref, we_ref, wl_ref, wh_ref, b_ref, out_ref):
        xe = xe_ref[...]                              # (B, input_size + O)
        x = xe[:, :input_size]
        eps = xe[:, input_size:input_size + O]
        hc = hc_ref[...]                              # (B, n_layers * 2H) = [h_l | c_l]...

        # embed = Linear(input_size, hidden_size); bias row 0 of the slab (padded to 4H)
        h = (jnp.dot(x, we_ref[...], preferred_element_type=jnp.float32)
             + b_ref[0:1, :H])

        # LSTMCell layers (full math, non-zero carried state supported):
        #   gates = [h_in | h_prev] @ [W_ih; W_hh] + (b_ih + b_hh)
        #   c = f * c_prev + i * g ;  h = o * tanh(c)
        state_out = []
        for l in range(n_layers):
            h_prev = hc[:, l * 2 * H: l * 2 * H + H]
            c_prev = hc[:, l * 2 * H + H: (l + 1) * 2 * H]
            inp = jnp.concatenate([h, h_prev], axis=-1)          # (B, 2H)
            gates = (jnp.dot(inp, wl_ref[l], preferred_element_type=jnp.float32)
                     + b_ref[1 + l: 2 + l, :])                   # (B, 4H)
            i_g = jax.nn.sigmoid(gates[:, 0:H])
            f_g = jax.nn.sigmoid(gates[:, H:2 * H])
            g_g = jnp.tanh(gates[:, 2 * H:3 * H])
            o_g = jax.nn.sigmoid(gates[:, 3 * H:4 * H])
            c = f_g * c_prev + i_g * g_g
            h = o_g * jnp.tanh(c)
            state_out.append(h)
            state_out.append(c)

        # fused mu|logvar head: one (H, 2*O) matmul, lane-sliced
        head = (jnp.dot(h, wh_ref[...], preferred_element_type=jnp.float32)
                + b_ref[1 + n_layers: 2 + n_layers, :2 * O])
        mu = head[:, :O]
        lv = head[:, O:2 * O]
        z = mu + eps * jnp.exp(0.5 * lv)

        # single lane-dense output slab: [z | mu | logvar | new state]
        out_ref[...] = jnp.concatenate([z, mu, lv] + state_out, axis=-1)

    return kernel


def pack_params(params, n_layers, output_size):
    """One-time host-side packing of all module parameters into a few slabs."""
    H = params["we"].shape[1]
    O = output_size
    assert 2 * O <= 4 * H, "bias slab packing assumes 2*output_size <= 4*hidden"

    # stacked fused LSTM weights: (n_layers, 2H, 4H) = [W_ih; W_hh] per layer
    w_lstm = jnp.stack(
        [jnp.concatenate([params["lstm"][l]["wih"], params["lstm"][l]["whh"]], axis=0)
         for l in range(n_layers)], axis=0)

    # fused head weight: (H, 2*O) = [wmu | wlv]
    w_head = jnp.concatenate([params["wmu"], params["wlv"]], axis=-1)

    # bias slab: (n_layers + 2, 4H)
    #   row 0              : embed bias (padded to 4H)
    #   rows 1..n_layers   : bih + bhh per layer
    #   row n_layers + 1   : [bmu | blv] (padded to 4H)
    rows = [jnp.pad(params["be"], ((0, 0), (0, 4 * H - H)))]
    for l in range(n_layers):
        p = params["lstm"][l]
        rows.append(p["bih"] + p["bhh"])
    head_b = jnp.concatenate([params["bmu"], params["blv"]], axis=-1)
    rows.append(jnp.pad(head_b, ((0, 0), (0, 4 * H - 2 * O))))
    bias_slab = jnp.concatenate(rows, axis=0)

    return {
        "we": params["we"],        # (input_size, H)
        "w_lstm": w_lstm,          # (n_layers, 2H, 4H)
        "w_head": w_head,          # (H, 2*O)
        "bias": bias_slab,         # (n_layers + 2, 4H)
    }


@partial(jax.jit, static_argnames=("n_layers", "output_size"))
def gaussian_lstm_forward(x, eps, hc, packed, *, n_layers, output_size):
    """Whole forward pass (incl. state update) in one Pallas invocation.

    hc: (B, n_layers * 2 * H) packed carried state, layout per layer [h | c].
    Returns (z, mu, logvar, hc_new).
    """
    B, input_size = x.shape
    H = packed["we"].shape[1]
    O = output_size

    xe = jnp.concatenate([x, eps], axis=-1)   # one input DMA for both

    vmem = pl.BlockSpec(memory_space=pltpu.MemorySpace.VMEM)
    out = pl.pallas_call(
        make_kernel(n_layers, input_size, H, O),
        out_shape=jax.ShapeDtypeStruct((B, 3 * O + n_layers * 2 * H), jnp.float32),
        in_specs=[vmem] * 6,
        out_specs=vmem,
    )(xe, hc, packed["we"], packed["w_lstm"], packed["w_head"], packed["bias"])

    z = out[:, 0:O]
    mu = out[:, O:2 * O]
    lv = out[:, 2 * O:3 * O]
    hc_new = out[:, 3 * O:]
    return z, mu, lv, hc_new


def init_hidden(batch_size, hidden_size, n_layers):
    """Matches PyTorch init_hidden(): zero h/c per layer, packed lane-dense."""
    return jnp.zeros((batch_size, n_layers * 2 * hidden_size), jnp.float32)


def reference_forward(x, eps, hidden, params, n_layers):
    """Pure-JAX reference mirroring the PyTorch module (stateful LSTMCells)."""
    H = params["we"].shape[1]
    h_in = x @ params["we"] + params["be"]
    new_hidden = []
    for l in range(n_layers):
        p = params["lstm"][l]
        h_prev, c_prev = hidden[l]
        gates = h_in @ p["wih"] + p["bih"] + h_prev @ p["whh"] + p["bhh"]
        i_g = jax.nn.sigmoid(gates[:, 0:H])
        f_g = jax.nn.sigmoid(gates[:, H:2 * H])
        g_g = jnp.tanh(gates[:, 2 * H:3 * H])
        o_g = jax.nn.sigmoid(gates[:, 3 * H:4 * H])
        c = f_g * c_prev + i_g * g_g
        h_in = o_g * jnp.tanh(c)
        new_hidden.append((h_in, c))
    mu = h_in @ params["wmu"] + params["bmu"]
    lv = h_in @ params["wlv"] + params["blv"]
    z = mu + eps * jnp.exp(0.5 * lv)
    return z, mu, lv, new_hidden


def pack_state(hidden):
    return jnp.concatenate(
        [jnp.concatenate([h, c], axis=-1) for (h, c) in hidden], axis=-1)


def init_params(key, input_size, output_size, hidden_size, n_layers):
    """Deterministic synthetic parameters (shapes match the PyTorch __init__).
    Linear/LSTMCell weights kept pre-transposed to (in_features, out_features)."""
    ks = jax.random.split(key, 6 + 4 * n_layers)
    s = 0.1
    params = {
        "we": s * jax.random.normal(ks[0], (input_size, hidden_size), jnp.float32),
        "be": s * jax.random.normal(ks[1], (1, hidden_size), jnp.float32),
        "wmu": s * jax.random.normal(ks[2], (hidden_size, output_size), jnp.float32),
        "bmu": s * jax.random.normal(ks[3], (1, output_size), jnp.float32),
        "wlv": s * jax.random.normal(ks[4], (hidden_size, output_size), jnp.float32),
        "blv": s * jax.random.normal(ks[5], (1, output_size), jnp.float32),
        "lstm": [],
    }
    for l in range(n_layers):
        k0, k1, k2, k3 = ks[6 + 4 * l: 10 + 4 * l]
        params["lstm"].append({
            "wih": s * jax.random.normal(k0, (hidden_size, 4 * hidden_size), jnp.float32),
            "whh": s * jax.random.normal(k1, (hidden_size, 4 * hidden_size), jnp.float32),
            "bih": s * jax.random.normal(k2, (1, 4 * hidden_size), jnp.float32),
            "bhh": s * jax.random.normal(k3, (1, 4 * hidden_size), jnp.float32),
        })
    return params


if __name__ == "__main__":
    input_size = 16
    output_size = 8
    hidden_size = 32
    n_layers = 2
    batch_size = 8

    key = jax.random.PRNGKey(0)
    k_param, k_x1, k_e1, k_x2, k_e2 = jax.random.split(key, 5)

    params = init_params(k_param, input_size, output_size, hidden_size, n_layers)
    packed = pack_params(params, n_layers, output_size)

    x1 = jax.random.normal(k_x1, (batch_size, input_size), jnp.float32)
    x2 = jax.random.normal(k_x2, (batch_size, input_size), jnp.float32)
    # torch.randn_like(std) equivalent noise, generated deterministically host-side.
    # TODO(synk): could be drawn in-kernel with pltpu.stateful_normal, but kept
    # host-side so the reference check stays exact.
    eps1 = jax.random.normal(k_e1, (batch_size, output_size), jnp.float32)
    eps2 = jax.random.normal(k_e2, (batch_size, output_size), jnp.float32)

    # Two chained forward calls to exercise the carried-over hidden state
    # (matches the stateful PyTorch module: self.hidden updated each call).
    hc0 = init_hidden(batch_size, hidden_size, n_layers)
    z1, mu1, lv1, hc1 = gaussian_lstm_forward(
        x1, eps1, hc0, packed, n_layers=n_layers, output_size=output_size)
    z2, mu2, lv2, hc2 = gaussian_lstm_forward(
        x2, eps2, hc1, packed, n_layers=n_layers, output_size=output_size)
    jax.block_until_ready((z1, mu1, lv1, hc1, z2, mu2, lv2, hc2))

    # Pure-JAX reference (stateful), two steps.
    hidden = [(jnp.zeros((batch_size, hidden_size), jnp.float32),
               jnp.zeros((batch_size, hidden_size), jnp.float32))
              for _ in range(n_layers)]
    zr1, mur1, lvr1, hidden = reference_forward(x1, eps1, hidden, params, n_layers)
    hc1_ref = pack_state(hidden)
    zr2, mur2, lvr2, hidden = reference_forward(x2, eps2, hidden, params, n_layers)
    hc2_ref = pack_state(hidden)

    tol = dict(atol=1e-4, rtol=1e-4)
    assert jnp.allclose(z1, zr1, **tol)
    assert jnp.allclose(mu1, mur1, **tol)
    assert jnp.allclose(lv1, lvr1, **tol)
    assert jnp.allclose(hc1, hc1_ref, **tol)
    assert jnp.allclose(z2, zr2, **tol)
    assert jnp.allclose(mu2, mur2, **tol)
    assert jnp.allclose(lv2, lvr2, **tol)
    assert jnp.allclose(hc2, hc2_ref, **tol)

    print("KERNEL_OK")
</pallas_src>

<mosaic_0001>
module attributes {stable_mosaic.version = 11 : i64} {
  func.func @kernel(%arg0: memref<8x24xf32, #tpu.memory_space<vmem>>, %arg1: memref<8x128xf32, #tpu.memory_space<vmem>>, %arg2: memref<16x32xf32, #tpu.memory_space<vmem>>, %arg3: memref<2x64x128xf32, #tpu.memory_space<vmem>>, %arg4: memref<32x16xf32, #tpu.memory_space<vmem>>, %arg5: memref<4x128xf32, #tpu.memory_space<vmem>>, %arg6: memref<8x152xf32, #tpu.memory_space<vmem>>) attributes {dimension_semantics = [], scalar_prefetch = 0 : i64, scratch_operands = 0 : i64, tpu.core_type = #tpu.core_type<tc>} {
    %c0 = arith.constant 0 : index
    %c0_0 = arith.constant 0 : index
    %0 = vector.load %arg0[%c0, %c0_0] : memref<8x24xf32, #tpu.memory_space<vmem>>, vector<8x24xf32>
    %1 = vector.extract_strided_slice %0 {offsets = [0, 0], sizes = [8, 16], strides = [1, 1]} : vector<8x24xf32> to vector<8x16xf32>
    %2 = vector.extract_strided_slice %0 {offsets = [0, 16], sizes = [8, 8], strides = [1, 1]} : vector<8x24xf32> to vector<8x8xf32>
    %c0_1 = arith.constant 0 : index
    %c0_2 = arith.constant 0 : index
    %3 = vector.load %arg1[%c0_1, %c0_2] : memref<8x128xf32, #tpu.memory_space<vmem>>, vector<8x128xf32>
    %c0_3 = arith.constant 0 : index
    %c0_4 = arith.constant 0 : index
    %4 = vector.load %arg2[%c0_3, %c0_4] : memref<16x32xf32, #tpu.memory_space<vmem>>, vector<16x32xf32>
    %cst = arith.constant dense<0.000000e+00> : vector<8x32xf32>
    %5 = tpu.matmul %1, %4, %cst {dimension_numbers = #tpu.dot_dimension_numbers<[1], [0], [0], [1], [0, 0, 1, 1], [], []>} : vector<8x16xf32>, vector<16x32xf32>, vector<8x32xf32> -> vector<8x32xf32>
    %c0_5 = arith.constant 0 : index
    %c0_6 = arith.constant 0 : index
    %6 = vector.load %arg5[%c0_5, %c0_6] : memref<4x128xf32, #tpu.memory_space<vmem>>, vector<1x32xf32>
    %7 = vector.broadcast %6 : vector<1x32xf32> to vector<8x32xf32>
    %8 = arith.addf %5, %7 : vector<8x32xf32>
    %9 = vector.extract_strided_slice %3 {offsets = [0, 0], sizes = [8, 32], strides = [1, 1]} : vector<8x128xf32> to vector<8x32xf32>
    %10 = vector.extract_strided_slice %3 {offsets = [0, 32], sizes = [8, 32], strides = [1, 1]} : vector<8x128xf32> to vector<8x32xf32>
    %11 = tpu.concatenate %8, %9 in 1 : vector<8x32xf32>, vector<8x32xf32> -> vector<8x64xf32>
    %c0_7 = arith.constant 0 : index
    %c0_8 = arith.constant 0 : index
    %c0_9 = arith.constant 0 : index
    %12 = vector.load %arg3[%c0_7, %c0_8, %c0_9] : memref<2x64x128xf32, #tpu.memory_space<vmem>>, vector<1x64x128xf32>
    %13 = vector.shape_cast %12 : vector<1x64x128xf32> to vector<64x128xf32>
    %cst_10 = arith.constant dense<0.000000e+00> : vector<8x128xf32>
    %14 = tpu.matmul %11, %13, %cst_10 {dimension_numbers = #tpu.dot_dimension_numbers<[1], [0], [0], [1], [0, 0, 1, 1], [], []>} : vector<8x64xf32>, vector<64x128xf32>, vector<8x128xf32> -> vector<8x128xf32>
    %c1 = arith.constant 1 : index
    %c0_11 = arith.constant 0 : index
    %15 = vector.load %arg5[%c1, %c0_11] : memref<4x128xf32, #tpu.memory_space<vmem>>, vector<1x128xf32>
    %16 = vector.broadcast %15 : vector<1x128xf32> to vector<8x128xf32>
    %17 = arith.addf %14, %16 : vector<8x128xf32>
    %18 = vector.extract_strided_slice %17 {offsets = [0, 0], sizes = [8, 32], strides = [1, 1]} : vector<8x128xf32> to vector<8x32xf32>
    %19 = arith.negf %18 : vector<8x32xf32>
    %20 = math.exp %19 : vector<8x32xf32>
    %cst_12 = arith.constant 1.000000e+00 : f32
    %21 = vector.broadcast %cst_12 : f32 to vector<8x32xf32>
    %22 = arith.addf %21, %20 : vector<8x32xf32>
    %23 = arith.divf %21, %22 : vector<8x32xf32>
    %24 = vector.extract_strided_slice %17 {offsets = [0, 32], sizes = [8, 32], strides = [1, 1]} : vector<8x128xf32> to vector<8x32xf32>
    %25 = arith.negf %24 : vector<8x32xf32>
    %26 = math.exp %25 : vector<8x32xf32>
    %cst_13 = arith.constant 1.000000e+00 : f32
    %27 = vector.broadcast %cst_13 : f32 to vector<8x32xf32>
    %28 = arith.addf %27, %26 : vector<8x32xf32>
    %29 = arith.divf %27, %28 : vector<8x32xf32>
    %30 = vector.extract_strided_slice %17 {offsets = [0, 64], sizes = [8, 32], strides = [1, 1]} : vector<8x128xf32> to vector<8x32xf32>
    %31 = math.tanh %30 : vector<8x32xf32>
    %32 = vector.extract_strided_slice %17 {offsets = [0, 96], sizes = [8, 32], strides = [1, 1]} : vector<8x128xf32> to vector<8x32xf32>
    %33 = arith.negf %32 : vector<8x32xf32>
    %34 = math.exp %33 : vector<8x32xf32>
    %cst_14 = arith.constant 1.000000e+00 : f32
    %35 = vector.broadcast %cst_14 : f32 to vector<8x32xf32>
    %36 = arith.addf %35, %34 : vector<8x32xf32>
    %37 = arith.divf %35, %36 : vector<8x32xf32>
    %38 = arith.mulf %29, %10 : vector<8x32xf32>
    %39 = arith.mulf %23, %31 : vector<8x32xf32>
    %40 = arith.addf %38, %39 : vector<8x32xf32>
    %41 = math.tanh %40 : vector<8x32xf32>
    %42 = arith.mulf %37, %41 : vector<8x32xf32>
    %43 = vector.extract_strided_slice %3 {offsets = [0, 64], sizes = [8, 32], strides = [1, 1]} : vector<8x128xf32> to vector<8x32xf32>
    %44 = vector.extract_strided_slice %3 {offsets = [0, 96], sizes = [8, 32], strides = [1, 1]} : vector<8x128xf32> to vector<8x32xf32>
    %45 = tpu.concatenate %42, %43 in 1 : vector<8x32xf32>, vector<8x32xf32> -> vector<8x64xf32>
    %c1_15 = arith.constant 1 : index
    %c0_16 = arith.constant 0 : index
    %c0_17 = arith.constant 0 : index
    %46 = vector.load %arg3[%c1_15, %c0_16, %c0_17] : memref<2x64x128xf32, #tpu.memory_space<vmem>>, vector<1x64x128xf32>
    %47 = vector.shape_cast %46 : vector<1x64x128xf32> to vector<64x128xf32>
    %cst_18 = arith.constant dense<0.000000e+00> : vector<8x128xf32>
    %48 = tpu.matmul %45, %47, %cst_18 {dimension_numbers = #tpu.dot_dimension_numbers<[1], [0], [0], [1], [0, 0, 1, 1], [], []>} : vector<8x64xf32>, vector<64x128xf32>, vector<8x128xf32> -> vector<8x128xf32>
    %c2 = arith.constant 2 : index
    %c0_19 = arith.constant 0 : index
    %49 = vector.load %arg5[%c2, %c0_19] : memref<4x128xf32, #tpu.memory_space<vmem>>, vector<1x128xf32>
    %50 = vector.broadcast %49 : vector<1x128xf32> to vector<8x128xf32>
    %51 = arith.addf %48, %50 : vector<8x128xf32>
    %52 = vector.extract_strided_slice %51 {offsets = [0, 0], sizes = [8, 32], strides = [1, 1]} : vector<8x128xf32> to vector<8x32xf32>
    %53 = arith.negf %52 : vector<8x32xf32>
    %54 = math.exp %53 : vector<8x32xf32>
    %cst_20 = arith.constant 1.000000e+00 : f32
    %55 = vector.broadcast %cst_20 : f32 to vector<8x32xf32>
    %56 = arith.addf %55, %54 : vector<8x32xf32>
    %57 = arith.divf %55, %56 : vector<8x32xf32>
    %58 = vector.extract_strided_slice %51 {offsets = [0, 32], sizes = [8, 32], strides = [1, 1]} : vector<8x128xf32> to vector<8x32xf32>
    %59 = arith.negf %58 : vector<8x32xf32>
    %60 = math.exp %59 : vector<8x32xf32>
    %cst_21 = arith.constant 1.000000e+00 : f32
    %61 = vector.broadcast %cst_21 : f32 to vector<8x32xf32>
    %62 = arith.addf %61, %60 : vector<8x32xf32>
    %63 = arith.divf %61, %62 : vector<8x32xf32>
    %64 = vector.extract_strided_slice %51 {offsets = [0, 64], sizes = [8, 32], strides = [1, 1]} : vector<8x128xf32> to vector<8x32xf32>
    %65 = math.tanh %64 : vector<8x32xf32>
    %66 = vector.extract_strided_slice %51 {offsets = [0, 96], sizes = [8, 32], strides = [1, 1]} : vector<8x128xf32> to vector<8x32xf32>
    %67 = arith.negf %66 : vector<8x32xf32>
    %68 = math.exp %67 : vector<8x32xf32>
    %cst_22 = arith.constant 1.000000e+00 : f32
    %69 = vector.broadcast %cst_22 : f32 to vector<8x32xf32>
    %70 = arith.addf %69, %68 : vector<8x32xf32>
    %71 = arith.divf %69, %70 : vector<8x32xf32>
    %72 = arith.mulf %63, %44 : vector<8x32xf32>
    %73 = arith.mulf %57, %65 : vector<8x32xf32>
    %74 = arith.addf %72, %73 : vector<8x32xf32>
    %75 = math.tanh %74 : vector<8x32xf32>
    %76 = arith.mulf %71, %75 : vector<8x32xf32>
    %c0_23 = arith.constant 0 : index
    %c0_24 = arith.constant 0 : index
    %77 = vector.load %arg4[%c0_23, %c0_24] : memref<32x16xf32, #tpu.memory_space<vmem>>, vector<32x16xf32>
    %cst_25 = arith.constant dense<0.000000e+00> : vector<8x16xf32>
    %78 = tpu.matmul %76, %77, %cst_25 {dimension_numbers = #tpu.dot_dimension_numbers<[1], [0], [0], [1], [0, 0, 1, 1], [], []>} : vector<8x32xf32>, vector<32x16xf32>, vector<8x16xf32> -> vector<8x16xf32>
    %c3 = arith.constant 3 : index
    %c0_26 = arith.constant 0 : index
    %79 = vector.load %arg5[%c3, %c0_26] : memref<4x128xf32, #tpu.memory_space<vmem>>, vector<1x16xf32>
    %80 = vector.broadcast %79 : vector<1x16xf32> to vector<8x16xf32>
    %81 = arith.addf %78, %80 : vector<8x16xf32>
    %82 = vector.extract_strided_slice %81 {offsets = [0, 0], sizes = [8, 8], strides = [1, 1]} : vector<8x16xf32> to vector<8x8xf32>
    %83 = vector.extract_strided_slice %81 {offsets = [0, 8], sizes = [8, 8], strides = [1, 1]} : vector<8x16xf32> to vector<8x8xf32>
    %cst_27 = arith.constant 5.000000e-01 : f32
    %84 = vector.broadcast %cst_27 : f32 to vector<8x8xf32>
    %85 = arith.mulf %84, %83 : vector<8x8xf32>
    %86 = math.exp %85 : vector<8x8xf32>
    %87 = arith.mulf %2, %86 : vector<8x8xf32>
    %88 = arith.addf %82, %87 : vector<8x8xf32>
    %89 = tpu.concatenate %88, %82, %83, %42, %40, %76, %74 in 1 : vector<8x8xf32>, vector<8x8xf32>, vector<8x8xf32>, vector<8x32xf32>, vector<8x32xf32>, vector<8x32xf32>, vector<8x32xf32> -> vector<8x152xf32>
    %c0_28 = arith.constant 0 : index
    %c0_29 = arith.constant 0 : index
    %90 = vector.load %arg6[%c0_28, %c0_29] : memref<8x152xf32, #tpu.memory_space<vmem>>, vector<8x152xf32>
    tpu.vector_store %arg6[%c0_28, %c0_29], %89 {strides = array<i32>} : memref<8x152xf32, #tpu.memory_space<vmem>>, vector<8x152xf32>,
    return
  }
}

</mosaic_0001>

<bundles_post_ra>
// kernel: gaussian_lstm_forward.1
= control target key start
LH: loop header
LB: loop body
LE: loop exit
PB: predicated region body
PF: predicated region fallthrough
CT: control target
= control target key end

     0   :  { %11 = vsyncpa [#allocation3], 0  ;;  %s637_s21 = smov [#allocation2]   ;;  %s798_s0 = inlined_call_operand.vmem [shape: f32[8,24], index: 0, kind: input, shape index: {}]   ;;  %s799_s1 = inlined_call_operand.vmem [shape: f32[8,128], index: 1, kind: input, shape index: {}]   ;;  %s800_s2 = inlined_call_operand.vmem [shape: f32[16,32], index: 2, kind: input, shape index: {}]   ;;  %s801_s3 = inlined_call_operand.hbm [shape: f32[2,64,128], index: 3, kind: input, shape index: {}]   ;;  %s802_s4 = inlined_call_operand.vmem [shape: f32[32,16], index: 4, kind: input, shape index: {}]   ;;  %s803_s5 = inlined_call_operand.vmem [shape: f32[4,128], index: 5, kind: input, shape index: {}]   ;;  %s804_s6 = inlined_call_operand.vmem [shape: f32[8,152], index: 6, kind: output, shape index: {}]  }
   0x1   :  { %s23_s22 = sshll.u32 %s637_s21, 4  ;;  %s24_s22 = int_to_ptr.vmem [resolvable:$true] %s23_s22 }
   0x2   :  { %s623_s23 = scalar_lea.vmem %s24_s22, 2048  ;;  %p628_p1 = scmp.lt.s32.totalorder %s24_s22, %s24_s22 }
   0x3   :  { %p624_p0 = scmp.ne.s32.totalorder %s24_s22, %s623_s23  ;;  %p629_p2 = scmp.lt.s32.totalorder %s623_s23, %s623_s23 }
   0x5   :  { %p630_p3 = por %p629_p2, %p628_p1 }
   0x7   :  { %p631_p4 = pnand %p630_p3, %p624_p0 }
   0x9   :  { %634 = shalt.err (!%p631_p4)
}
   0xa   :  { %s638_s24 = smov 128   ;;  %s639_s25 = smov 8  }
   0xb   :  { %29 = dma.hbm_to_vmem [thread:$0]  %s801_s3, 2048, %s24_s22, [#allocation3], %s638_s24, %s638_s24, %s639_s25  }
   0xc   :  { %635 = dma.done.wait [#allocation3], 2048  }
   0xd   :  { %636 = vsyncadd [#allocation3], 4294965248  ;;  %v640_v0 = vmov 0.0   ;;  %vm641_vm0 = vmmov 0   ;;  %v40_v1 = vld [vmem:[%s800_s2 + $0x8] sm:$0xff]  ;;  %v39_v2 = vld [vmem:[%s800_s2] sm:$0xff] }
   0xe   :  { %528 = vmatprep.subr.mxu0 %v640_v0  ;;  %532 = vmatprep.mubr.msk.f32.mxu0 %vm641_vm0, %v640_v0  ;;  %v704_v3 = vld [vmem:[%s798_s0] sm:$0xff]  ;;  %vm46_vm1 = vcmask 130048   ;;  %v133_v5 = vld [vmem:[#allocation2 + $0x38] sm:$0xff]  ;;  %s642_s11 = smov 32   ;;  %v132_v6 = vld [vmem:[#allocation2 + $0x30] sm:$0xff]  ;;  %vm124_vm2 = vcmask 261120  }
   0xf   :  { %535 = vmatprep.subr.mxu1 %v640_v0  ;;  %551 = vmatprep.mubr.msk.f32.mxu1 %vm641_vm0, %v640_v0  ;;  %v709_v4 = vld [vmem:[%s799_s1] sm:$0xff]  ;;  %v131_v7 = vld [vmem:[#allocation2 + $0x28] sm:$0xff]  ;;  %v129_v9 = vld [vmem:[#allocation2 + $0x18] sm:$0xff]  ;;  %vm139_vm3 = vcmask 523264   ;;  %s643_s13 = smov 64   ;;  %s644_s14 = smov 96  }
  0x10   :  { %529 = vmatpush3.msra.mxu0 %v40_v1  ;;  %121 = vrot.lane.b32.xlu0 %v709_v4, %s642_s11  ;;  %v130_v8 = vld [vmem:[#allocation2 + $0x20] sm:$0xff]  ;;  %v128_v10 = vld [vmem:[#allocation2 + $0x10] sm:$0xff]  ;;  %v127_v11 = vld [vmem:[#allocation2 + $0x8] sm:$0xff]  ;;  %s646_s28 = smov 88   ;;  %s648_s29 = smov 56   ;;  %vm477_vm4 = vcmask 195584  }
  0x11   :  { %530 = vmatprep.subr.mxu0 %v640_v0  ;;  %536 = vmatpush3.msra.mxu1 %v133_v5  ;;  %v126_v12 = vld [vmem:[#allocation2] sm:$0xff]  ;;  %v253_v33 = vld [vmem:[#allocation2 + $0x78] sm:$0xff]  ;;  %v252_v34 = vld [vmem:[#allocation2 + $0x70] sm:$0xff]  ;;  %s649_s30 = smov 120   ;;  %vm474_vm5 = vcmask 64512   ;;  %vm479_vm6 = vcmask 457728  }
  0x12   :  { %531 = vmatpush3.msra.mxu0 %v39_v2  ;;  %537 = vmatprep.subr.mxu1 %v640_v0  ;;  %v492_v13 = vld [vmem:[%s803_s5] ss:$0 sm:$0xff]  ;;  %v494_v19 = vld [vmem:[%s803_s5 + $0x1] ss:$0 sm:$0xff]  ;;  %v251_v35 = vld [vmem:[#allocation2 + $0x68] sm:$0xff]  ;;  %vm481_vm7 = vcmask 719872  }
  0x13   :  { %533 = vmatmul.mubr.msk.f32.vlgmr.msra.gmra.mxu0 %vm46_vm1, %v704_v3  ;;  %538 = vmatpush3.msra.mxu1 %v132_v6  ;;  %v250_v36 = vld [vmem:[#allocation2 + $0x60] sm:$0xff]  ;;  %v249_v37 = vld [vmem:[#allocation2 + $0x58] sm:$0xff]  ;;  %v248_v38 = vld [vmem:[#allocation2 + $0x50] sm:$0xff]  ;;  %vm483_vm8 = vcmask 982016  }
  0x14   :  { %554 = vmatprep.subr.mxu0 %v640_v0  ;;  %539 = vmatprep.subr.mxu1 %v640_v0  ;;  %v247_v40 = vld [vmem:[#allocation2 + $0x48] sm:$0xff]  ;;  %v246_v41 = vld [vmem:[#allocation2 + $0x40] sm:$0xff]  ;;  %v362_v62 = vld [vmem:[%s802_s4 + $0x18] sm:$0xff] }
  0x15   :  { %570 = vmatprep.mubr.msk.f32.mxu0 %vm641_vm0, %v640_v0  ;;  %540 = vmatpush3.msra.mxu1 %v131_v7  ;;  %v497_v47 = vld [vmem:[%s803_s5 + $0x2] ss:$0 sm:$0xff]  ;;  %v361_v63 = vld [vmem:[%s802_s4 + $0x10] sm:$0xff]  ;;  %v360_v1 = vld [vmem:[%s802_s4 + $0x8] sm:$0xff] }
  0x16   :  { %541 = vmatprep.subr.mxu1 %v640_v0  ;;  %555 = vmatpush3.msra.mxu0 %v253_v33  ;;  %v359_v2 = vld [vmem:[%s802_s4] sm:$0xff]  ;;  %s645_s4 = smov 24  }
  0x17   :  { %542 = vmatpush3.msra.mxu1 %v130_v8  ;;  %556 = vmatprep.subr.mxu0 %v640_v0  ;;  %v500_v8 = vld [vmem:[%s803_s5 + $0x3] ss:$0 sm:$0xff]  ;;  %s647_s5 = smov 112  }
  0x18   :  { %543 = vmatprep.subr.mxu1 %v640_v0  ;;  %557 = vmatpush3.msra.mxu0 %v252_v34 }
  0x19   :  { %544 = vmatpush3.msra.mxu1 %v129_v9  ;;  %558 = vmatprep.subr.mxu0 %v640_v0 }
  0x1a   :  { %545 = vmatprep.subr.mxu1 %v640_v0  ;;  %559 = vmatpush3.msra.mxu0 %v251_v35 }
  0x1b   :  { %546 = vmatpush3.msra.mxu1 %v128_v10  ;;  %560 = vmatprep.subr.mxu0 %v640_v0 }
  0x1c   :  { %547 = vmatprep.subr.mxu1 %v640_v0  ;;  %561 = vmatpush3.msra.mxu0 %v250_v36 }
  0x1d   :  { %548 = vmatpush3.msra.mxu1 %v127_v11  ;;  %562 = vmatprep.subr.mxu0 %v640_v0 }
  0x1e   :  { %549 = vmatprep.subr.mxu1 %v640_v0  ;;  %563 = vmatpush3.msra.mxu0 %v249_v37 }
  0x1f   :  { %550 = vmatpush3.msra.mxu1 %v126_v12  ;;  %564 = vmatprep.subr.mxu0 %v640_v0 }
  0x20   :  { %573 = vmatprep.subr.mxu1 %v640_v0  ;;  %565 = vmatpush3.msra.mxu0 %v248_v38 }
  0x21   :  { %566 = vmatprep.subr.mxu0 %v640_v0 }
  0x22   :  { %567 = vmatpush3.msra.mxu0 %v247_v40 }
  0x23   :  { %568 = vmatprep.subr.mxu0 %v640_v0 }
  0x24   :  { %569 = vmatpush3.msra.mxu0 %v246_v41 }
  0x82   :  { %v122_v15 = vpop.permute.xlu0 %121 }
  0xd3   :  { %v116_v14 = vpop.f32.mrf.mxu0 }
  0xd4   :  { %v117_v16 = vadd.f32 %v492_v13, %v116_v14 }
  0xd5   :  { %v534_v17 = vpop.f32.mrf.mxu0 }
  0xd6   :  { %v125_v18 = vsel %vm124_vm2, %v117_v16, %v122_v15 }
  0xd7   :  { %552 = vmatmul.mubr.msk.f32.vlgmr.msra.gmra.mxu1 %vm139_vm3, %v125_v18 }
  0xd8   :  { %581 = vmatprep.mubr.msk.f32.mxu1 %vm641_vm0, %v640_v0  ;;  %574 = vmatpush3.msra.mxu1 %v362_v62 }
  0xd9   :  { %575 = vmatprep.subr.mxu1 %v640_v0 }
  0xda   :  { %576 = vmatpush3.msra.mxu1 %v361_v63 }
  0xdb   :  { %577 = vmatprep.subr.mxu1 %v640_v0 }
  0xdc   :  { %578 = vmatpush3.msra.mxu1 %v360_v1 }
  0xdd   :  { %579 = vmatprep.subr.mxu1 %v640_v0 }
  0xde   :  { %580 = vmatpush3.msra.mxu1 %v359_v2 }
 0x197   :  { %v209_v20 = vpop.f32.mrf.mxu1 }
 0x198   :  { %v210_v21 = vadd.f32 %v494_v19, %v209_v20 }
 0x199   :  { %v553_v22 = vpop.f32.mrf.mxu1 }
 0x19a   :  { %597 = vtanh.f32 %v210_v21  ;;  %v496_v24 = vmul.f32 -1.442695, %v210_v21 }
 0x19c   :  { %599 = vpow2.f32 %v496_v24 }
 0x1a7   :  { %v598_v23 = vpop.eup %597 }
 0x1a8   :  { %222 = vrot.lane.b32.xlu0 %v598_v23, %s643_s13 }
 0x1a9   :  { %v600_v25 = vpop.eup %599 }
 0x1aa   :  { %v216_v26 = vadd.f32 1.0, %v600_v25 }
 0x1ac   :  { %601 = vrcp.f32 %v216_v26 }
 0x1b9   :  { %v602_v27 = vpop.eup %601 }
 0x1ba   :  { %v220_v30 = vmul.f32 %v602_v27, %v709_v4 }
 0x21a   :  { %v223_v28 = vpop.permute.xlu0 %222 }
 0x21b   :  { %v225_v29 = vmul.f32 %v602_v27, %v223_v28 }
 0x21d   :  { %227 = vrot.lane.b32.xlu1 %v225_v29, %s642_s11 }
 0x28f   :  { %v228_v31 = vpop.permute.xlu1 %227 }
 0x290   :  { %v740_v32 = vadd.f32 %v228_v31, %v220_v30 }
 0x292   :  { %603 = vtanh.f32 %v740_v32 }
 0x29f   :  { %v604_v39 = vpop.eup %603 }
 0x2a0   :  { %233 = vrot.lane.b32.xlu1 %v604_v39, %s643_s13 }
 0x2a4   :  { %241 = vrot.lane.b32.xlu1 %v709_v4, %s644_s14 }
 0x2a8   :  { %339 = vrot.lane.b32.xlu1 %v709_v4, %s643_s13 }
 0x312   :  { %v234_v42 = vpop.permute.xlu1 %233 }
 0x313   :  { %v754_v43 = vmul.f32 %v602_v27, %v234_v42 }
 0x315   :  { %238 = vrot.lane.b32.xlu0 %v754_v43, %s642_s11 }
 0x316   :  { %v242_v44 = vpop.permute.xlu1 %241 }
 0x31a   :  { %v340_v58 = vpop.permute.xlu1 %339 }
 0x387   :  { %v239_v45 = vpop.permute.xlu0 %238 }
 0x388   :  { %v244_v46 = vsel %vm124_vm2, %v239_v45, %v242_v44 }
 0x389   :  { %571 = vmatmul.mubr.msk.f32.vlgmr.msra.gmra.mxu0 %vm139_vm3, %v244_v46 }
 0x449   :  { %v328_v48 = vpop.f32.mrf.mxu0 }
 0x44a   :  { %v329_v49 = vadd.f32 %v497_v47, %v328_v48 }
 0x44b   :  { %v572_v50 = vpop.f32.mrf.mxu0 }
 0x44c   :  { %605 = vtanh.f32 %v329_v49  ;;  %v499_v52 = vmul.f32 -1.442695, %v329_v49 }
 0x44e   :  { %607 = vpow2.f32 %v499_v52 }
 0x459   :  { %v606_v51 = vpop.eup %605 }
 0x45a   :  { %344 = vrot.lane.b32.xlu0 %v606_v51, %s643_s13 }
 0x45b   :  { %v608_v53 = vpop.eup %607 }
 0x45c   :  { %v335_v54 = vadd.f32 1.0, %v608_v53 }
 0x45e   :  { %609 = vrcp.f32 %v335_v54 }
 0x46b   :  { %v610_v55 = vpop.eup %609 }
 0x46c   :  { %v342_v59 = vmul.f32 %v610_v55, %v340_v58 }
 0x4cc   :  { %v345_v56 = vpop.permute.xlu0 %344 }
 0x4cd   :  { %v347_v57 = vmul.f32 %v610_v55, %v345_v56 }
 0x4cf   :  { %349 = vrot.lane.b32.xlu0 %v347_v57, %s642_s11 }
 0x541   :  { %v350_v60 = vpop.permute.xlu0 %349 }
 0x542   :  { %v352_v61 = vadd.f32 %v350_v60, %v342_v59 }
 0x544   :  { %611 = vtanh.f32 %v352_v61 }
 0x551   :  { %v612_v4 = vpop.eup %611 }
 0x552   :  { %355 = vrot.lane.b32.xlu1 %v612_v4, %s643_s13 }
 0x5c4   :  { %v356_v5 = vpop.permute.xlu1 %355 }
 0x5c5   :  { %v358_v6 = vmul.f32 %v610_v55, %v356_v5 }
 0x5c7   :  { %369 = vrot.lane.b32.xlu0 %v358_v6, %s642_s11 }
 0x639   :  { %v370_v7 = vpop.permute.xlu0 %369 }
 0x63a   :  { %582 = vmatmul.mubr.msk.f32.vlgmr.msra.gmra.mxu1 %vm124_vm2, %v370_v7 }
 0x6fa   :  { %v439_v9 = vpop.f32.mrf.mxu1 }
 0x6fb   :  { %v440_v10 = vadd.f32 %v500_v8, %v439_v9 }
 0x6fc   :  { %v583_v11 = vpop.f32.mrf.mxu1 }
 0x6fd   :  { %v443_v12 = vmul.f32 0.5, %v440_v10 }
 0x6ff   :  { %v444_v0 = vmul.f32 1.442695, %v443_v12 }
 0x701   :  { %613 = vpow2.f32 %v444_v0 }
 0x70e   :  { %v614_v13 = vpop.eup %613 }
 0x70f   :  { %447 = vrot.lane.b32.xlu1 %v614_v13, %s639_s25 }
 0x713   :  { %457 = vrot.lane.b32.xlu1 %v440_v10, %s639_s25 }
 0x717   :  { %464 = vrot.lane.b32.xlu1 %v740_v32, %s645_s4 }
 0x71b   :  { %471 = vrot.lane.b32.xlu1 %v352_v61, %s646_s28 }
 0x781   :  { %v448_v14 = vpop.permute.xlu1 %447 }
 0x782   :  { %v450_v15 = vmul.f32 %v448_v14, %v704_v3 }
 0x784   :  { %452 = vrot.lane.b32.xlu0 %v450_v15, %s647_s5 }
 0x785   :  { %v458_v16 = vpop.permute.xlu1 %457 }
 0x788   :  { %460 = vrot.lane.b32.xlu0 %v754_v43, %s648_s29 }
 0x789   :  { %v465_v17 = vpop.permute.xlu1 %464 }
 0x78c   :  { %467 = vrot.lane.b32.xlu0 %v358_v6, %s649_s30 }
 0x78d   :  { %v472_v18 = vpop.permute.xlu1 %471 }
 0x78e   :  { %486 = vst.msk [vmem:[%s804_s6 + $0x8] sm:$0xff] %vm477_vm4, %v472_v18 }
 0x7f6   :  { %v453_v19 = vpop.permute.xlu0 %452 }
 0x7f7   :  { %v455_v20 = vadd.f32 %v453_v19, %v440_v10 }
 0x7f9   :  { %v475_v21 = vsel %vm474_vm5, %v455_v20, %v458_v16 }
 0x7fa   :  { %v461_v3 = vpop.permute.xlu0 %460  ;;  %v476_v22 = vsel %vm46_vm1, %v475_v21, %v458_v16 }
 0x7fb   :  { %v478_v23 = vsel %vm477_vm4, %v476_v22, %v461_v3 }
 0x7fc   :  { %v480_v25 = vsel %vm479_vm6, %v478_v23, %v465_v17 }
 0x7fe   :  { %v468_v24 = vpop.permute.xlu0 %467 }
 0x7ff   :  { %v482_v26 = vsel %vm481_vm7, %v480_v25, %v468_v24 }
 0x800   :  { %v484_v27 = vsel %vm483_vm8, %v482_v26, %v472_v18 }
 0x801   :  { %485 = vst [vmem:[%s804_s6] sm:$0xff] %v484_v27 }
 0x802   :  { %491 = vsyncpa [#allocation3], 1 }

</bundles_post_ra>
